<compile_context>
chip_gen: v7x
topology: tpu7x:2x2x1
jax: 0.10.0
libtpu: 0.0.40
codegen_flags: <defaults>
</compile_context>

<pallas_src>
import functools

import jax
import jax.numpy as jnp
from jax.experimental import pallas as pl
from jax.experimental.pallas import tpu as pltpu


def _round_up(n, m):
    return ((n + m - 1) // m) * m


def _elu(x):
    # ELU with alpha=1.0 (PyTorch default): x if x > 0 else exp(x) - 1.
    # The exp argument is clamped so the unselected branch never produces inf.
    return jnp.where(x > 0, x, jnp.exp(jnp.minimum(x, 0.0)) - 1.0)


def env_discriminator_kernel(x_ref, w1_ref, b1_ref, w2_ref, b2_ref,
                             w3_ref, b3_ref, o_ref):
    # Cast x to the (possibly bf16) weight dtype here, in VMEM, so the wrapper
    # never makes an extra HBM pass over x.  No-op if dtypes already match.
    x = x_ref[...].astype(w1_ref.dtype)

    # Layer 1: Linear(rep_size -> width_p) + ELU  (bias add / ELU in f32).
    h1 = jnp.dot(x, w1_ref[...], preferred_element_type=jnp.float32)
    h1 = _elu(h1 + b1_ref[...])

    # Layer 2: Linear(width_p -> width_p) + ELU.
    h2 = jnp.dot(h1.astype(w2_ref.dtype), w2_ref[...],
                 preferred_element_type=jnp.float32)
    h2 = _elu(h2 + b2_ref[...])

    # Layer 3: Linear(width_p -> num_envs), no final nonlinearity.
    h3 = jnp.dot(h2.astype(w3_ref.dtype), w3_ref[...],
                 preferred_element_type=jnp.float32)
    o_ref[...] = (h3 + b3_ref[...]).astype(o_ref.dtype)


@functools.partial(jax.jit, static_argnames=("block_b", "compute_dtype"))
def env_discriminator_forward(x, params, block_b=2048,
                              compute_dtype=jnp.bfloat16):
    """Fused EnvDiscriminator forward, tiled over the batch dimension."""
    w1, b1, w2, b2, w3, b3 = params
    B, in_dim = x.shape
    width = w1.shape[1]
    num_envs = w3.shape[1]

    # ---- lane-pad the hidden width to a multiple of 128 (weights are tiny,
    # VMEM-resident; output dim stays unpadded) -----------------------------
    width_p = _round_up(width, 128)
    dw = width_p - width

    # Pre-cast weights once to the MXU compute dtype; biases stay f32.
    w1p = jnp.pad(w1, ((0, 0), (0, dw))).astype(compute_dtype)
    b1p = jnp.pad(b1, ((0, 0), (0, dw)))
    w2p = jnp.pad(w2, ((0, dw), (0, dw))).astype(compute_dtype)
    b2p = jnp.pad(b2, ((0, 0), (0, dw)))
    w3p = jnp.pad(w3, ((0, dw), (0, 0))).astype(compute_dtype)

    # ---- batch tiling: large tiles, but keep >= 2 grid steps (v7x has 2 TCs);
    # ragged B handled by the cdiv grid (partial last tile, no jnp.pad of x) --
    half = _round_up(pl.cdiv(B, 2), 8)
    block = max(8, min(_round_up(block_b, 8), half))
    grid = (pl.cdiv(B, block),)

    def replicated(shape):
        # Full-array block with a constant index_map: weights/biases stay
        # resident in VMEM across the whole grid (no re-DMA).
        return pl.BlockSpec(shape, lambda i: (0,) * len(shape))

    out = pl.pallas_call(
        env_discriminator_kernel,
        out_shape=jax.ShapeDtypeStruct((B, num_envs), jnp.float32),
        grid_spec=pl.GridSpec(
            grid=grid,
            in_specs=[
                pl.BlockSpec((block, in_dim), lambda i: (i, 0)),  # x tile
                replicated((in_dim, width_p)),    # w1
                replicated((1, width_p)),         # b1
                replicated((width_p, width_p)),   # w2
                replicated((1, width_p)),         # b2
                replicated((width_p, num_envs)),  # w3
                replicated((1, num_envs)),        # b3
            ],
            out_specs=pl.BlockSpec((block, num_envs), lambda i: (i, 0)),
        ),
        compiler_params=pltpu.CompilerParams(
            dimension_semantics=("parallel",)),
    )(x, w1p, b1p, w2p, b2p, w3p, b3)

    return out


def init_params(key, representation_size, num_envs, width):
    """Deterministic init matching EnvDiscriminator(rep_size, num_envs, width).

    Mimics PyTorch's default Linear init: U(-1/sqrt(fan_in), 1/sqrt(fan_in)).
    Weights stored transposed as (in_features, out_features).
    """
    ks = jax.random.split(key, 6)

    def linear(kw, kb, fan_in, fan_out):
        bound = 1.0 / jnp.sqrt(fan_in)
        w = jax.random.uniform(kw, (fan_in, fan_out), jnp.float32, -bound, bound)
        b = jax.random.uniform(kb, (1, fan_out), jnp.float32, -bound, bound)
        return w, b

    w1, b1 = linear(ks[0], ks[1], representation_size, width)
    w2, b2 = linear(ks[2], ks[3], width, width)
    w3, b3 = linear(ks[4], ks[5], width, num_envs)
    return (w1, b1, w2, b2, w3, b3)


def reference_forward(x, params):
    w1, b1, w2, b2, w3, b3 = params
    h1 = _elu(x @ w1 + b1)
    h2 = _elu(h1 @ w2 + b2)
    return h2 @ w3 + b3


if __name__ == "__main__":
    # Small, module-consistent shapes.
    batch = 256
    representation_size = 32
    num_envs = 8
    width = 64

    key = jax.random.PRNGKey(0)
    k_x, k_p = jax.random.split(key)
    x = jax.random.normal(k_x, (batch, representation_size), jnp.float32)
    params = init_params(k_p, representation_size, num_envs, width)

    ref = reference_forward(x, params)

    # f32 compute path (tight correctness check).  block clamps to 128 here,
    # giving a 2-step "parallel" grid (both v7x TensorCores busy).
    out = env_discriminator_forward(x, params, compute_dtype=jnp.float32)
    out = jax.block_until_ready(out)
    assert out.shape == (batch, num_envs)
    assert jnp.allclose(out, ref, atol=1e-5, rtol=1e-5), "f32 mismatch vs reference"

    # Default bf16-weight / bf16-matmul path (MXU-native on v5e/v6e/v7x),
    # f32 bias/ELU/accumulation.
    out_bf16 = jax.block_until_ready(env_discriminator_forward(x, params))
    assert out_bf16.shape == (batch, num_envs)
    assert jnp.allclose(out_bf16, ref, atol=1e-1, rtol=1e-1), "bf16 mismatch vs reference"

    # Ragged batch (not a multiple of the tile): exercises the cdiv grid with a
    # partial, discarded-padding last tile — no jnp.pad copy of x.
    x_r = x[:200]
    ref_r = reference_forward(x_r, params)
    out_r = jax.block_until_ready(
        env_discriminator_forward(x_r, params, compute_dtype=jnp.float32))
    assert out_r.shape == (200, num_envs)
    assert jnp.allclose(out_r, ref_r, atol=1e-5, rtol=1e-5), "ragged-B mismatch vs reference"

    print("KERNEL_OK")
</pallas_src>

<mosaic_0001>
module attributes {stable_mosaic.version = 11 : i64} {
  func.func @env_discriminator_kernel(%arg0: i32, %arg1: memref<128x32xf32, #tpu.memory_space<vmem>>, %arg2: memref<32x128xf32, #tpu.memory_space<vmem>>, %arg3: memref<1x128xf32, #tpu.memory_space<vmem>>, %arg4: memref<128x128xf32, #tpu.memory_space<vmem>>, %arg5: memref<1x128xf32, #tpu.memory_space<vmem>>, %arg6: memref<128x8xf32, #tpu.memory_space<vmem>>, %arg7: memref<1x8xf32, #tpu.memory_space<vmem>>, %arg8: memref<128x8xf32, #tpu.memory_space<vmem>>) attributes {dimension_semantics = [#tpu.dimension_semantics<parallel>], iteration_bounds = array<i64: 2>, scalar_prefetch = 0 : i64, scratch_operands = 0 : i64, tpu.core_type = #tpu.core_type<tc>, window_params = [{transform_indices = @transform_0, window_bounds = array<i64: 128, 32>}, {pipeline_mode = #tpu.pipeline_mode<synchronous>, transform_indices = @transform_1, window_bounds = array<i64: 32, 128>}, {pipeline_mode = #tpu.pipeline_mode<synchronous>, transform_indices = @transform_2, window_bounds = array<i64: 1, 128>}, {pipeline_mode = #tpu.pipeline_mode<synchronous>, transform_indices = @transform_3, window_bounds = array<i64: 128, 128>}, {pipeline_mode = #tpu.pipeline_mode<synchronous>, transform_indices = @transform_4, window_bounds = array<i64: 1, 128>}, {pipeline_mode = #tpu.pipeline_mode<synchronous>, transform_indices = @transform_5, window_bounds = array<i64: 128, 8>}, {pipeline_mode = #tpu.pipeline_mode<synchronous>, transform_indices = @transform_6, window_bounds = array<i64: 1, 8>}, {transform_indices = @transform_7, window_bounds = array<i64: 128, 8>}]} {
    %c0 = arith.constant 0 : index
    %c0_0 = arith.constant 0 : index
    %0 = vector.load %arg1[%c0, %c0_0] : memref<128x32xf32, #tpu.memory_space<vmem>>, vector<128x32xf32>
    %c0_1 = arith.constant 0 : index
    %c0_2 = arith.constant 0 : index
    %1 = vector.load %arg2[%c0_1, %c0_2] : memref<32x128xf32, #tpu.memory_space<vmem>>, vector<32x128xf32>
    %cst = arith.constant dense<0.000000e+00> : vector<128x128xf32>
    %2 = tpu.matmul %0, %1, %cst {dimension_numbers = #tpu.dot_dimension_numbers<[1], [0], [0], [1], [0, 0, 1, 1], [], []>} : vector<128x32xf32>, vector<32x128xf32>, vector<128x128xf32> -> vector<128x128xf32>
    %c0_3 = arith.constant 0 : index
    %c0_4 = arith.constant 0 : index
    %3 = vector.load %arg3[%c0_3, %c0_4] : memref<1x128xf32, #tpu.memory_space<vmem>>, vector<1x128xf32>
    %4 = vector.broadcast %3 : vector<1x128xf32> to vector<128x128xf32>
    %5 = arith.addf %2, %4 : vector<128x128xf32>
    %cst_5 = arith.constant 0.000000e+00 : f32
    %6 = vector.broadcast %cst_5 : f32 to vector<128x128xf32>
    %7 = arith.cmpf ogt, %5, %6 : vector<128x128xf32>
    %cst_6 = arith.constant 0.000000e+00 : f32
    %8 = vector.broadcast %cst_6 : f32 to vector<128x128xf32>
    %9 = arith.minimumf %5, %8 : vector<128x128xf32>
    %10 = math.exp %9 : vector<128x128xf32>
    %cst_7 = arith.constant 1.000000e+00 : f32
    %11 = vector.broadcast %cst_7 : f32 to vector<128x128xf32>
    %12 = arith.subf %10, %11 : vector<128x128xf32>
    %13 = arith.select %7, %5, %12 : vector<128x128xi1>, vector<128x128xf32>
    %c0_8 = arith.constant 0 : index
    %c0_9 = arith.constant 0 : index
    %14 = vector.load %arg4[%c0_8, %c0_9] : memref<128x128xf32, #tpu.memory_space<vmem>>, vector<128x128xf32>
    %cst_10 = arith.constant dense<0.000000e+00> : vector<128x128xf32>
    %15 = tpu.matmul %13, %14, %cst_10 {dimension_numbers = #tpu.dot_dimension_numbers<[1], [0], [0], [1], [0, 0, 1, 1], [], []>} : vector<128x128xf32>, vector<128x128xf32>, vector<128x128xf32> -> vector<128x128xf32>
    %c0_11 = arith.constant 0 : index
    %c0_12 = arith.constant 0 : index
    %16 = vector.load %arg5[%c0_11, %c0_12] : memref<1x128xf32, #tpu.memory_space<vmem>>, vector<1x128xf32>
    %17 = vector.broadcast %16 : vector<1x128xf32> to vector<128x128xf32>
    %18 = arith.addf %15, %17 : vector<128x128xf32>
    %cst_13 = arith.constant 0.000000e+00 : f32
    %19 = vector.broadcast %cst_13 : f32 to vector<128x128xf32>
    %20 = arith.cmpf ogt, %18, %19 : vector<128x128xf32>
    %cst_14 = arith.constant 0.000000e+00 : f32
    %21 = vector.broadcast %cst_14 : f32 to vector<128x128xf32>
    %22 = arith.minimumf %18, %21 : vector<128x128xf32>
    %23 = math.exp %22 : vector<128x128xf32>
    %cst_15 = arith.constant 1.000000e+00 : f32
    %24 = vector.broadcast %cst_15 : f32 to vector<128x128xf32>
    %25 = arith.subf %23, %24 : vector<128x128xf32>
    %26 = arith.select %20, %18, %25 : vector<128x128xi1>, vector<128x128xf32>
    %c0_16 = arith.constant 0 : index
    %c0_17 = arith.constant 0 : index
    %27 = vector.load %arg6[%c0_16, %c0_17] : memref<128x8xf32, #tpu.memory_space<vmem>>, vector<128x8xf32>
    %cst_18 = arith.constant dense<0.000000e+00> : vector<128x8xf32>
    %28 = tpu.matmul %26, %27, %cst_18 {dimension_numbers = #tpu.dot_dimension_numbers<[1], [0], [0], [1], [0, 0, 1, 1], [], []>} : vector<128x128xf32>, vector<128x8xf32>, vector<128x8xf32> -> vector<128x8xf32>
    %c0_19 = arith.constant 0 : index
    %c0_20 = arith.constant 0 : index
    %29 = vector.load %arg7[%c0_19, %c0_20] : memref<1x8xf32, #tpu.memory_space<vmem>>, vector<1x8xf32>
    %30 = vector.broadcast %29 : vector<1x8xf32> to vector<128x8xf32>
    %31 = arith.addf %28, %30 : vector<128x8xf32>
    %c0_21 = arith.constant 0 : index
    %c0_22 = arith.constant 0 : index
    %32 = vector.load %arg8[%c0_21, %c0_22] : memref<128x8xf32, #tpu.memory_space<vmem>>, vector<128x8xf32>
    tpu.vector_store %arg8[%c0_21, %c0_22], %31 {strides = array<i32>} : memref<128x8xf32, #tpu.memory_space<vmem>>, vector<128x8xf32>,
    return
  }
  func.func @transform_0(%arg0: i32) -> (i32, i32) {
    %c0_i32 = arith.constant 0 : i32
    %c0_i32_0 = arith.constant 0 : i32
    return %arg0, %c0_i32 : i32, i32
  }
  func.func @transform_1(%arg0: i32) -> (i32, i32) {
    %c0_i32 = arith.constant 0 : i32
    %c0_i32_0 = arith.constant 0 : i32
    %c0_i32_1 = arith.constant 0 : i32
    return %c0_i32, %c0_i32_0 : i32, i32
  }
  func.func @transform_2(%arg0: i32) -> (i32, i32) {
    %c0_i32 = arith.constant 0 : i32
    %c0_i32_0 = arith.constant 0 : i32
    %c0_i32_1 = arith.constant 0 : i32
    return %c0_i32, %c0_i32_0 : i32, i32
  }
  func.func @transform_3(%arg0: i32) -> (i32, i32) {
    %c0_i32 = arith.constant 0 : i32
    %c0_i32_0 = arith.constant 0 : i32
    %c0_i32_1 = arith.constant 0 : i32
    return %c0_i32, %c0_i32_0 : i32, i32
  }
  func.func @transform_4(%arg0: i32) -> (i32, i32) {
    %c0_i32 = arith.constant 0 : i32
    %c0_i32_0 = arith.constant 0 : i32
    %c0_i32_1 = arith.constant 0 : i32
    return %c0_i32, %c0_i32_0 : i32, i32
  }
  func.func @transform_5(%arg0: i32) -> (i32, i32) {
    %c0_i32 = arith.constant 0 : i32
    %c0_i32_0 = arith.constant 0 : i32
    %c0_i32_1 = arith.constant 0 : i32
    return %c0_i32, %c0_i32_0 : i32, i32
  }
  func.func @transform_6(%arg0: i32) -> (i32, i32) {
    %c0_i32 = arith.constant 0 : i32
    %c0_i32_0 = arith.constant 0 : i32
    %c0_i32_1 = arith.constant 0 : i32
    return %c0_i32, %c0_i32_0 : i32, i32
  }
  func.func @transform_7(%arg0: i32) -> (i32, i32) {
    %c0_i32 = arith.constant 0 : i32
    %c0_i32_0 = arith.constant 0 : i32
    return %arg0, %c0_i32 : i32, i32
  }
}

</mosaic_0001>

<bundles_post_ra>
// kernel: env_discriminator_forward.1
= control target key start
LH: loop header
LB: loop body
LE: loop exit
PB: predicated region body
PF: predicated region fallthrough
CT: control target
= control target key end

     0   :  { %s1602_s24 = smov 0   ;;  %s1995_s0 = inlined_call_operand.vmem [shape: f32[256,32], index: 0, kind: input, shape index: {}]   ;;  %s1996_s1 = inlined_call_operand.vmem [shape: f32[32,128], index: 1, kind: input, shape index: {}]   ;;  %s1997_s2 = inlined_call_operand.vmem [shape: f32[1,128], index: 2, kind: input, shape index: {}]   ;;  %s1998_s3 = inlined_call_operand.vmem [shape: f32[128,128], index: 3, kind: input, shape index: {}]   ;;  %s1999_s4 = inlined_call_operand.vmem [shape: f32[1,128], index: 4, kind: input, shape index: {}]   ;;  %s2000_s5 = inlined_call_operand.vmem [shape: f32[128,8], index: 5, kind: input, shape index: {}]   ;;  %s2001_s6 = inlined_call_operand.vmem [shape: f32[1,8], index: 6, kind: input, shape index: {}]   ;;  %s2002_s7 = inlined_call_operand.vmem [shape: f32[256,8], index: 7, kind: output, shape index: {}]  }
   0x1 LB: > { %s1104_s25 = sadd.s32 4294967295, %s1560_s24   ;;  %p1108_p0 = scmp.ge.s32.totalorder %s1560_s24, 1  ;;  %s1560_s24 = sphi %s1602_s24, %s17_s24  }
   0x2   : > { %p238_p1 = scmp.lt.s32.totalorder %s1560_s24, 3 }
   0x4   : > { %p239_p2 = pnand %p1108_p0, %p238_p1 }
   0x5   : > { %v298_v0 = vld [vmem:[%s1996_s1] sm:$0xff] (!%p239_p2)  ;;  %v299_v1 = vld [vmem:[%s1996_s1 + $0x8] sm:$0xff] (!%p239_p2)  ;;  %v300_v2 = vld [vmem:[%s1996_s1 + $0x10] sm:$0xff] (!%p239_p2)  ;;  %s1109_s9 = sshll.u32 (!%p239_p2), %s1104_s25, 4  ;;  %vm309_vm0 = vcmask (!%p239_p2), 261120  }
   0x6   : > { %242 = sbr.rel (%p239_p2) target bundleno = 730 (0x2da), region = 48  ;;  %v1394_v3 = vpack.c.bf16 (!%p239_p2), %v299_v1, %v298_v0  ;;  %v301_v4 = vld [vmem:[%s1996_s1 + $0x18] sm:$0xff] (!%p239_p2)  ;;  %p271_p3 = scmp.lt.s32.totalorder (!%p239_p2), %s1109_s9, 31  ;;  %v599_v5 = vld [vmem:[%s1998_s3] sm:$0xff] (!%p239_p2)  ;;  %v600_v6 = vld [vmem:[%s1998_s3 + $0x8] sm:$0xff] (!%p239_p2) }
   0x7   : > { %v1398_v7 = vpack.c.bf16 (!%p239_p2), %v301_v4, %v300_v2  ;;  %v1402_v8 = vpack.c.bf16 (!%p239_p2), %v600_v6, %v599_v5  ;;  %v601_v9 = vld [vmem:[%s1998_s3 + $0x10] sm:$0xff] (!%p239_p2)  ;;  %v602_v10 = vld [vmem:[%s1998_s3 + $0x18] sm:$0xff] (!%p239_p2)  ;;  %v603_v12 = vld [vmem:[%s1998_s3 + $0x20] sm:$0xff] (!%p239_p2) }
   0x8   : > { %1395 = vmatprep.subr.bf16.mxu0 (!%p239_p2), %v1394_v3  ;;  %v1406_v11 = vpack.c.bf16 (!%p239_p2), %v602_v10, %v601_v9  ;;  %v604_v13 = vld [vmem:[%s1998_s3 + $0x28] sm:$0xff] (!%p239_p2)  ;;  %v605_v31 = vld [vmem:[%s1998_s3 + $0x30] sm:$0xff] (!%p239_p2)  ;;  %v606_v32 = vld [vmem:[%s1998_s3 + $0x38] sm:$0xff] (!%p239_p2) }
   0x9   : > { %1397 = vmatpush3.bf16.msra.mxu0 (!%p239_p2), %v1394_v3  ;;  %1403 = vmatprep.subr.bf16.mxu1 (!%p239_p2), %v1402_v8  ;;  %v1410_v14 = vpack.c.bf16 (!%p239_p2), %v604_v13, %v603_v12  ;;  %v1414_v33 = vpack.c.bf16 (!%p239_p2), %v606_v32, %v605_v31  ;;  %v607_v34 = vld [vmem:[%s1998_s3 + $0x40] sm:$0xff] (!%p239_p2)  ;;  %v608_v35 = vld [vmem:[%s1998_s3 + $0x48] sm:$0xff] (!%p239_p2)  ;;  %v609_v37 = vld [vmem:[%s1998_s3 + $0x50] sm:$0xff] (!%p239_p2) }
   0xa   : > { %1399 = vmatprep.subr.bf16.mxu0 (!%p239_p2), %v1398_v7  ;;  %1405 = vmatpush3.bf16.msra.mxu1 (!%p239_p2), %v1402_v8  ;;  %v1418_v36 = vpack.c.bf16 (!%p239_p2), %v608_v35, %v607_v34  ;;  %v610_v38 = vld [vmem:[%s1998_s3 + $0x58] sm:$0xff] (!%p239_p2)  ;;  %v611_v40 = vld [vmem:[%s1998_s3 + $0x60] sm:$0xff] (!%p239_p2)  ;;  %v612_v41 = vld [vmem:[%s1998_s3 + $0x68] sm:$0xff] (!%p239_p2) }
   0xb   : > { %1407 = vmatprep.subr.bf16.mxu1 (!%p239_p2), %v1406_v11  ;;  %v1422_v39 = vpack.c.bf16 (!%p239_p2), %v610_v38, %v609_v37  ;;  %v1426_v42 = vpack.c.bf16 (!%p239_p2), %v612_v41, %v611_v40  ;;  %v613_v43 = vld [vmem:[%s1998_s3 + $0x70] sm:$0xff] (!%p239_p2)  ;;  %v614_v44 = vld [vmem:[%s1998_s3 + $0x78] sm:$0xff] (!%p239_p2)  ;;  %v863_v46 = vld [vmem:[%s2000_s5] sm:$0xff] (!%p239_p2) }
   0xc   : > { %v1430_v45 = vpack.c.bf16 (!%p239_p2), %v614_v44, %v613_v43  ;;  %v864_v47 = vld [vmem:[%s2000_s5 + $0x8] sm:$0xff] (!%p239_p2)  ;;  %v865_v48 = vld [vmem:[%s2000_s5 + $0x10] sm:$0xff] (!%p239_p2)  ;;  %v866_v50 = vld [vmem:[%s2000_s5 + $0x18] sm:$0xff] (!%p239_p2) }
   0xd   : > { %s2004_s9 = smov (!%p271_p3, %s1109_s9), 31  ;;  %1401 = vmatpush3.bf16.msra.mxu0 %v1398_v7  ;;  %v1721_v49 = vpack.c.bf16 %v864_v47, %v863_v46  ;;  %v1726_v51 = vpack.c.bf16 %v866_v50, %v865_v48  ;;  %v867_v52 = vld [vmem:[%s2000_s5 + $0x20] sm:$0xff]  ;;  %v868_v53 = vld [vmem:[%s2000_s5 + $0x28] sm:$0xff] }
   0xe   : > { %s1110_s25 = sshll.u32 %s2004_s9, 3  ;;  %1409 = vmatpush3.bf16.msra.mxu1 %v1406_v11  ;;  %v1738_v54 = vpack.c.bf16 %v868_v53, %v867_v52  ;;  %v1746_v55 = vld [vmem:[%s1997_s2] ss:$0 sm:$0xff] }
   0xf   : > { %s1648_s28 = scalar_lea.vmem %s1995_s0, %s1110_s25  ;;  %1411 = vmatprep.subr.bf16.mxu1 %v1410_v14  ;;  %1435 = vmatprep.subr.bf16.mxu0 %v1721_v49  ;;  %s1958_s29 = scalar_lea.vmem %s2002_s7, %s1110_s25 }
  0x10   : > { %v282_v15 = vld [vmem:[%s1648_s28] sm:$0xff]  ;;  %v283_v16 = vld [vmem:[%s1648_s28 + $0x8] sm:$0xff]  ;;  %v284_v17 = vld [vmem:[%s1648_s28 + $0x10] sm:$0xff] }
  0x11   : > { %1258 = vmatprep.mubr.msk.f32.mxu0 %vm309_vm0, %v282_v15  ;;  %v285_v18 = vld [vmem:[%s1648_s28 + $0x18] sm:$0xff]  ;;  %v286_v19 = vld [vmem:[%s1648_s28 + $0x20] sm:$0xff]  ;;  %v287_v20 = vld [vmem:[%s1648_s28 + $0x28] sm:$0xff] }
  0x12   : > { %1259 = vmatmul.mubr.msk.f32.vlgmr.msra.gmra.mrb[0].mxu0 %vm309_vm0, %v283_v16  ;;  %1413 = vmatpush3.bf16.msra.mxu1 %v1410_v14  ;;  %v288_v21 = vld [vmem:[%s1648_s28 + $0x30] sm:$0xff]  ;;  %v289_v22 = vld [vmem:[%s1648_s28 + $0x38] sm:$0xff]  ;;  %v290_v23 = vld [vmem:[%s1648_s28 + $0x40] sm:$0xff] }
  0x13   : > { %1261 = vmatprep.mubr.msk.f32.mxu0 %vm309_vm0, %v284_v17  ;;  %v291_v24 = vld [vmem:[%s1648_s28 + $0x48] sm:$0xff]  ;;  %v292_v25 = vld [vmem:[%s1648_s28 + $0x50] sm:$0xff]  ;;  %v293_v26 = vld [vmem:[%s1648_s28 + $0x58] sm:$0xff]  ;;  %1415 = vmatprep.subr.bf16.mxu1 %v1414_v33 }
  0x14   : > { %v294_v27 = vld [vmem:[%s1648_s28 + $0x60] sm:$0xff]  ;;  %v295_v28 = vld [vmem:[%s1648_s28 + $0x68] sm:$0xff]  ;;  %v296_v29 = vld [vmem:[%s1648_s28 + $0x70] sm:$0xff]  ;;  %1437 = vmatpush3.bf16.msra.mxu0 %v1721_v49 }
  0x15   : > { %v297_v30 = vld [vmem:[%s1648_s28 + $0x78] sm:$0xff]  ;;  %1439 = vmatprep.subr.bf16.mxu0 %v1726_v51 }
  0x16   : > { %1262 = vmatmul.mubr.msk.f32.gmra.mrb[2].mxu0 %vm309_vm0, %v285_v18  ;;  %1417 = vmatpush3.bf16.msra.mxu1 %v1414_v33 }
  0x17   : > { %1264 = vmatprep.mubr.msk.f32.mxu0 %vm309_vm0, %v286_v19  ;;  %1419 = vmatprep.subr.bf16.mxu1 %v1418_v36 }
  0x18   : > { %1441 = vmatpush3.bf16.msra.mxu0 %v1726_v51 }
  0x19   : > { %1443 = vmatprep.subr.bf16.mxu0 %v1738_v54 }
  0x1a   : > { %1265 = vmatmul.mubr.msk.f32.gmra.mrb[4].mxu0 %vm309_vm0, %v287_v20  ;;  %1421 = vmatpush3.bf16.msra.mxu1 %v1418_v36 }
  0x1b   : > { %1267 = vmatprep.mubr.msk.f32.mxu0 %vm309_vm0, %v288_v21  ;;  %1423 = vmatprep.subr.bf16.mxu1 %v1422_v39 }
  0x1c   : > { %1445 = vmatpush3.bf16.msra.mxu0 %v1738_v54 }
  0x1e   : > { %1268 = vmatmul.mubr.msk.f32.gmra.mrb[6].mxu0 %vm309_vm0, %v289_v22  ;;  %1425 = vmatpush3.bf16.msra.mxu1 %v1422_v39 }
  0x1f   : > { %1270 = vmatprep.mubr.msk.f32.mxu0 %vm309_vm0, %v290_v23  ;;  %1427 = vmatprep.subr.bf16.mxu1 %v1426_v42 }
  0x22   : > { %1271 = vmatmul.mubr.msk.f32.gmra.mrb[8].mxu0 %vm309_vm0, %v291_v24  ;;  %1429 = vmatpush3.bf16.msra.mxu1 %v1426_v42 }
  0x23   : > { %1273 = vmatprep.mubr.msk.f32.mxu0 %vm309_vm0, %v292_v25  ;;  %1431 = vmatprep.subr.bf16.mxu1 %v1430_v45 }
  0x26   : > { %1274 = vmatmul.mubr.msk.f32.gmra.mrb[10].mxu0 %vm309_vm0, %v293_v26  ;;  %1433 = vmatpush3.bf16.msra.mxu1 %v1430_v45 }
  0x27   : > { %1276 = vmatprep.mubr.msk.f32.mxu0 %vm309_vm0, %v294_v27  ;;  %1466 = vmatprep.subr.bf16.mxu1 %v1721_v49 }
  0x2a   : > { %1277 = vmatmul.mubr.msk.f32.gmra.mrb[12].mxu0 %vm309_vm0, %v295_v28 }
  0x2b   : > { %1279 = vmatprep.mubr.msk.f32.mxu0 %vm309_vm0, %v296_v29 }
  0x2e   : > { %1280 = vmatmul.mubr.msk.f32.gmra.mrb[14].mxu0 %vm309_vm0, %v297_v30 }
  0xe5   : > { %v1260_v56 = vpop.f32.mrb[0].mxu0 }
  0xe6   : > { %v430_v57 = vadd.f32 %v1260_v56, %v1746_v55  ;;  %v424_v58 = vpop.f32.mrb[1].mxu0 }
  0xe7   : > { %v425_v59 = vadd.f32 %v1746_v55, %v424_v58 }
  0xe8   : > { %v520_v60 = vmin.f32 %v430_v57, 0.0  ;;  %vm504_vm2 = vcmp.gt.f32.partialorder %v430_v57, 0.0 }
  0xe9   : > { %v519_v61 = vmin.f32 %v425_v59, 0.0  ;;  %v1263_v62 = vpop.f32.mrb[2].mxu0  ;;  %vm503_vm1 = vcmp.gt.f32.partialorder %v425_v59, 0.0 }
  0xea   : > { %v537_v63 = vmul.f32 1.442695, %v520_v60  ;;  %v1751_v0 = vadd.f32 %v1263_v62, %v1746_v55  ;;  %v434_v1 = vpop.f32.mrb[3].mxu0 }
  0xeb   : > { %v535_v2 = vmul.f32 1.442695, %v519_v61  ;;  %v1754_v3 = vadd.f32 %v1746_v55, %v434_v1 }
  0xec   : > { %1490 = vpow2.f32 %v537_v63  ;;  %v522_v4 = vmin.f32 %v1751_v0, 0.0  ;;  %vm506_vm4 = vcmp.gt.f32.partialorder %v1751_v0, 0.0 }
  0xed   : > { %1492 = vpow2.f32 %v535_v2  ;;  %v521_v5 = vmin.f32 %v1754_v3, 0.0  ;;  %v1266_v6 = vpop.f32.mrb[4].mxu0  ;;  %vm505_vm3 = vcmp.gt.f32.partialorder %v1754_v3, 0.0 }
  0xee   : > { %v541_v7 = vmul.f32 1.442695, %v522_v4  ;;  %v1759_v8 = vadd.f32 %v1266_v6, %v1746_v55  ;;  %v444_v9 = vpop.f32.mrb[5].mxu0 }
  0xef   : > { %v539_v10 = vmul.f32 1.442695, %v521_v5  ;;  %v1762_v11 = vadd.f32 %v1746_v55, %v444_v9 }
  0xf0   : > { %1494 = vpow2.f32 %v541_v7  ;;  %v524_v12 = vmin.f32 %v1759_v8, 0.0  ;;  %vm508_vm6 = vcmp.gt.f32.partialorder %v1759_v8, 0.0 }
  0xf1   : > { %1496 = vpow2.f32 %v539_v10  ;;  %v523_v13 = vmin.f32 %v1762_v11, 0.0  ;;  %v1269_v14 = vpop.f32.mrb[6].mxu0  ;;  %vm507_vm5 = vcmp.gt.f32.partialorder %v1762_v11, 0.0 }
  0xf2   : > { %v545_v15 = vmul.f32 1.442695, %v524_v12  ;;  %v1767_v16 = vadd.f32 %v1269_v14, %v1746_v55  ;;  %v454_v17 = vpop.f32.mrb[7].mxu0 }
  0xf3   : > { %v543_v18 = vmul.f32 1.442695, %v523_v13  ;;  %v1770_v19 = vadd.f32 %v1746_v55, %v454_v17 }
  0xf4   : > { %1498 = vpow2.f32 %v545_v15  ;;  %v526_v20 = vmin.f32 %v1767_v16, 0.0  ;;  %vm510_vm8 = vcmp.gt.f32.partialorder %v1767_v16, 0.0 }
  0xf5   : > { %1500 = vpow2.f32 %v543_v18  ;;  %v525_v21 = vmin.f32 %v1770_v19, 0.0  ;;  %v1272_v22 = vpop.f32.mrb[8].mxu0  ;;  %vm509_vm7 = vcmp.gt.f32.partialorder %v1770_v19, 0.0 }
  0xf6   : > { %v1491_v23 = vpop.eup %1490  ;;  %v549_v24 = vmul.f32 1.442695, %v526_v20  ;;  %v1775_v25 = vadd.f32 %v1272_v22, %v1746_v55  ;;  %v464_v26 = vpop.f32.mrb[9].mxu0 }
  0xf7   : > { %v1493_v27 = vpop.eup %1492  ;;  %v547_v28 = vmul.f32 1.442695, %v525_v21  ;;  %v1778_v29 = vadd.f32 %v1746_v55, %v464_v26  ;;  %v1131_v30 = vadd.f32 -1.0, %v1491_v23 }
  0xf8   : > { %1502 = vpow2.f32 %v549_v24  ;;  %v528_v31 = vmin.f32 %v1775_v25, 0.0  ;;  %v1130_v32 = vadd.f32 -1.0, %v1493_v27  ;;  %vm512_vm10 = vcmp.gt.f32.partialorder %v1775_v25, 0.0 }
  0xf9   : > { %1504 = vpow2.f32 %v547_v28  ;;  %v527_v33 = vmin.f32 %v1778_v29, 0.0  ;;  %v1275_v34 = vpop.f32.mrb[10].mxu0  ;;  %v584_v43 = vsel %vm504_vm2, %v430_v57, %v1131_v30  ;;  %vm511_vm9 = vcmp.gt.f32.partialorder %v1778_v29, 0.0 }
  0xfa   : > { %v1495_v35 = vpop.eup %1494  ;;  %v553_v36 = vmul.f32 1.442695, %v528_v31  ;;  %v1783_v37 = vadd.f32 %v1275_v34, %v1746_v55  ;;  %v474_v38 = vpop.f32.mrb[11].mxu0  ;;  %v583_v39 = vsel %vm503_vm1, %v425_v59, %v1130_v32 }
  0xfb   : > { %v1497_v40 = vpop.eup %1496  ;;  %v551_v41 = vmul.f32 1.442695, %v527_v33  ;;  %v1786_v42 = vadd.f32 %v1746_v55, %v474_v38  ;;  %1314 = vmatprep.mubr.f32.mxu1 %v583_v39  ;;  %v1133_v44 = vadd.f32 -1.0, %v1495_v35 }
  0xfc   : > { %1506 = vpow2.f32 %v553_v36  ;;  %v530_v45 = vmin.f32 %v1783_v37, 0.0  ;;  %1315 = vmatmul.mubr.f32.vlgmr.msra.gmra.mrb[0].mxu1 %v584_v43  ;;  %v1132_v46 = vadd.f32 -1.0, %v1497_v40  ;;  %vm514_vm12 = vcmp.gt.f32.partialorder %v1783_v37, 0.0  ;;  %v869_v40 = vld [vmem:[%s2000_s5 + $0x30] sm:$0xff]  ;;  %v871_v43 = vld [vmem:[%s2000_s5 + $0x40] sm:$0xff] }
  0xfd   : > { %1508 = vpow2.f32 %v551_v41  ;;  %v529_v47 = vmin.f32 %v1786_v42, 0.0  ;;  %v1278_v48 = vpop.f32.mrb[12].mxu0  ;;  %1474 = vmatpush3.bf16.msra.mxu1 %v1721_v49  ;;  %v586_v49 = vsel %vm506_vm4, %v1751_v0, %v1133_v44  ;;  %vm513_vm11 = vcmp.gt.f32.partialorder %v1786_v42, 0.0  ;;  %v870_v41 = vld [vmem:[%s2000_s5 + $0x38] sm:$0xff]  ;;  %v872_v44 = vld [vmem:[%s2000_s5 + $0x48] sm:$0xff] }
  0xfe   : > { %v1499_v50 = vpop.eup %1498  ;;  %v557_v52 = vmul.f32 1.442695, %v530_v45  ;;  %v1793_v53 = vadd.f32 %v1278_v48, %v1746_v55  ;;  %v484_v56 = vpop.f32.mrb[13].mxu0  ;;  %v585_v57 = vsel %vm505_vm3, %v1754_v3, %v1132_v46  ;;  %1467 = vmatprep.subr.bf16.mxu1 %v1726_v51  ;;  %v1450_v45 = vpack.c.bf16 %v872_v44, %v871_v43  ;;  %v873_v46 = vld [vmem:[%s2000_s5 + $0x50] sm:$0xff] }
  0xff   : > { %v1501_v58 = vpop.eup %1500  ;;  %v555_v59 = vmul.f32 1.442695, %v529_v47  ;;  %v1799_v60 = vadd.f32 %v1746_v55, %v484_v56  ;;  %1317 = vmatprep.mubr.f32.mxu1 %v585_v57  ;;  %v1135_v61 = vadd.f32 -1.0, %v1499_v50  ;;  %v874_v47 = vld [vmem:[%s2000_s5 + $0x58] sm:$0xff]  ;;  %v875_v50 = vld [vmem:[%s2000_s5 + $0x60] sm:$0xff]  ;;  %v877_v56 = vld [vmem:[%s2000_s5 + $0x70] sm:$0xff] }
 0x100   : > { %1510 = vpow2.f32 %v557_v52  ;;  %v532_v62 = vmin.f32 %v1793_v53, 0.0  ;;  %1318 = vmatmul.mubr.f32.gmra.mrb[2].mxu1 %v586_v49  ;;  %v1134_v63 = vadd.f32 -1.0, %v1501_v58  ;;  %vm516_vm14 = vcmp.gt.f32.partialorder %v1793_v53, 0.0  ;;  %v876_v52 = vld [vmem:[%s2000_s5 + $0x68] sm:$0xff]  ;;  %v878_v57 = vld [vmem:[%s2000_s5 + $0x78] sm:$0xff] }
 0x101   : > { %1512 = vpow2.f32 %v555_v59  ;;  %v531_v1 = vmin.f32 %v1799_v60, 0.0  ;;  %v1281_v2 = vpop.f32.mrb[14].mxu0  ;;  %1475 = vmatpush3.bf16.msra.mxu1 %v1726_v51  ;;  %v588_v12 = vsel %vm508_vm6, %v1759_v8, %v1135_v61  ;;  %vm515_vm13 = vcmp.gt.f32.partialorder %v1799_v60, 0.0  ;;  %v1867_v59 = vld [vmem:[%s1999_s4] ss:$0 sm:$0xff] }
 0x102   : > { %v1503_v3 = vpop.eup %1502  ;;  %v561_v4 = vmul.f32 1.442695, %v532_v62  ;;  %v1807_v5 = vadd.f32 %v1281_v2, %v1746_v55  ;;  %v494_v0 = vpop.f32.mrb[15].mxu0  ;;  %v587_v6 = vsel %vm507_vm5, %v1762_v11, %v1134_v63  ;;  %1468 = vmatprep.subr.bf16.mxu1 %v1738_v54  ;;  %v1454_v48 = vpack.c.bf16 %v874_v47, %v873_v46 }
 0x103   : > { %v1505_v7 = vpop.eup %1504  ;;  %v559_v9 = vmul.f32 1.442695, %v531_v1  ;;  %v495_v10 = vadd.f32 %v1746_v55, %v494_v0  ;;  %1320 = vmatprep.mubr.f32.mxu1 %v587_v6  ;;  %v1137_v51 = vadd.f32 -1.0, %v1503_v3  ;;  %v1462_v58 = vpack.c.bf16 %v878_v57, %v877_v56 }
 0x104   : > { %1514 = vpow2.f32 %v561_v4  ;;  %v534_v13 = vmin.f32 %v1807_v5, 0.0  ;;  %1321 = vmatmul.mubr.f32.gmra.mrb[4].mxu1 %v588_v12  ;;  %v1136_v14 = vadd.f32 -1.0, %v1505_v7  ;;  %vm518_vm0 = vcmp.gt.f32.partialorder %v1807_v5, 0.0 }
 0x105   : > { %1516 = vpow2.f32 %v559_v9  ;;  %v533_v15 = vmin.f32 %v495_v10, 0.0  ;;  %1476 = vmatpush3.bf16.msra.mxu1 %v1738_v54  ;;  %v590_v20 = vsel %vm510_vm8, %v1767_v16, %v1137_v51  ;;  %vm517_vm15 = vcmp.gt.f32.partialorder %v495_v10, 0.0 }
 0x106   : > { %v1507_v11 = vpop.eup %1506  ;;  %v565_v17 = vmul.f32 1.442695, %v534_v13  ;;  %v589_v18 = vsel %vm509_vm7, %v1770_v19, %v1136_v14 }
 0x107   : > { %v1509_v55 = vpop.eup %1508  ;;  %v563_v8 = vmul.f32 1.442695, %v533_v15  ;;  %1323 = vmatprep.mubr.f32.mxu1 %v589_v18  ;;  %v1139_v21 = vadd.f32 -1.0, %v1507_v11 }
 0x108   : > { %1518 = vpow2.f32 %v565_v17  ;;  %1324 = vmatmul.mubr.f32.gmra.mrb[6].mxu1 %v590_v20  ;;  %v1138_v22 = vadd.f32 -1.0, %v1509_v55 }
 0x109   : > { %1520 = vpow2.f32 %v563_v8  ;;  %v592_v24 = vsel %vm512_vm10, %v1775_v25, %v1139_v21 }
 0x10a   : > { %v1511_v23 = vpop.eup %1510  ;;  %v591_v54 = vsel %vm511_vm9, %v1778_v29, %v1138_v22 }
 0x10b   : > { %v1513_v19 = vpop.eup %1512  ;;  %1326 = vmatprep.mubr.f32.mxu1 %v591_v54  ;;  %v1141_v26 = vadd.f32 -1.0, %v1511_v23 }
 0x10c   : > { %1327 = vmatmul.mubr.f32.gmra.mrb[8].mxu1 %v592_v24  ;;  %v1140_v27 = vadd.f32 -1.0, %v1513_v19 }
 0x10d   : > { %v594_v29 = vsel %vm514_vm12, %v1783_v37, %v1141_v26 }
 0x10e   : > { %v1515_v16 = vpop.eup %1514  ;;  %v593_v28 = vsel %vm513_vm11, %v1786_v42, %v1140_v27  ;;  %v1446_v42 = vpack.c.bf16 %v870_v41, %v869_v40 }
 0x10f   : > { %v1517_v30 = vpop.eup %1516  ;;  %1329 = vmatprep.mubr.f32.mxu1 %v593_v28  ;;  %v1143_v31 = vadd.f32 -1.0, %v1515_v16 }
 0x110   : > { %1330 = vmatmul.mubr.f32.gmra.mrb[10].mxu1 %v594_v29  ;;  %v1142_v32 = vadd.f32 -1.0, %v1517_v30  ;;  %1447 = vmatprep.subr.bf16.mxu0 %v1446_v42 }
 0x111   : > { %v596_v35 = vsel %vm516_vm14, %v1793_v53, %v1143_v31  ;;  %1469 = vmatprep.subr.bf16.mxu1 %v1446_v42  ;;  %1449 = vmatpush3.bf16.msra.mxu0 %v1446_v42  ;;  %v1458_v53 = vpack.c.bf16 %v876_v52, %v875_v50 }
 0x112   : > { %v1519_v25 = vpop.eup %1518  ;;  %v595_v33 = vsel %vm515_vm13, %v1799_v60, %v1142_v32  ;;  %1477 = vmatpush3.bf16.msra.mxu1 %v1446_v42  ;;  %1451 = vmatprep.subr.bf16.mxu0 %v1450_v45 }
 0x113   : > { %v1521_v34 = vpop.eup %1520  ;;  %1332 = vmatprep.mubr.f32.mxu1 %v595_v33  ;;  %v1145_v36 = vadd.f32 -1.0, %v1519_v25  ;;  %1470 = vmatprep.subr.bf16.mxu1 %v1450_v45 }
 0x114   : > { %1333 = vmatmul.mubr.f32.gmra.mrb[12].mxu1 %v596_v35  ;;  %v1144_v38 = vadd.f32 -1.0, %v1521_v34 }
 0x115   : > { %v598_v37 = vsel %vm518_vm0, %v1807_v5, %v1145_v36  ;;  %1453 = vmatpush3.bf16.msra.mxu0 %v1450_v45 }
 0x116   : > { %v597_v39 = vsel %vm517_vm15, %v495_v10, %v1144_v38  ;;  %1478 = vmatpush3.bf16.msra.mxu1 %v1450_v45  ;;  %1455 = vmatprep.subr.bf16.mxu0 %v1454_v48 }
 0x117   : > { %1335 = vmatprep.mubr.f32.mxu1 %v597_v39  ;;  %1471 = vmatprep.subr.bf16.mxu1 %v1454_v48 }
 0x118   : > { %1336 = vmatmul.mubr.f32.gmra.mrb[14].mxu1 %v598_v37 }
 0x119   : > { %1457 = vmatpush3.bf16.msra.mxu0 %v1454_v48 }
 0x11a   : > { %1479 = vmatpush3.bf16.msra.mxu1 %v1454_v48  ;;  %1459 = vmatprep.subr.bf16.mxu0 %v1458_v53 }
 0x11b   : > { %1472 = vmatprep.subr.bf16.mxu1 %v1458_v53 }
 0x11d   : > { %1461 = vmatpush3.bf16.msra.mxu0 %v1458_v53 }
 0x11e   : > { %1480 = vmatpush3.bf16.msra.mxu1 %v1458_v53  ;;  %1463 = vmatprep.subr.bf16.mxu0 %v1462_v58 }
 0x11f   : > { %1473 = vmatprep.subr.bf16.mxu1 %v1462_v58 }
 0x121   : > { %1465 = vmatpush3.bf16.msra.mxu0 %v1462_v58 }
 0x122   : > { %1481 = vmatpush3.bf16.msra.mxu1 %v1462_v58 }
 0x1cf   : > { %v1316_v60 = vpop.f32.mrb[0].mxu1 }
 0x1d0   : > { %v694_v49 = vadd.f32 %v1316_v60, %v1867_v59  ;;  %v688_v61 = vpop.f32.mrb[1].mxu1 }
 0x1d1   : > { %v689_v62 = vadd.f32 %v1867_v59, %v688_v61 }
 0x1d2   : > { %v784_v63 = vmin.f32 %v694_v49, 0.0  ;;  %vm768_vm2 = vcmp.gt.f32.partialorder %v694_v49, 0.0 }
 0x1d3   : > { %v783_v1 = vmin.f32 %v689_v62, 0.0  ;;  %v1319_v2 = vpop.f32.mrb[2].mxu1  ;;  %vm767_vm1 = vcmp.gt.f32.partialorder %v689_v62, 0.0 }
 0x1d4   : > { %v801_v3 = vmul.f32 1.442695, %v784_v63  ;;  %v1872_v4 = vadd.f32 %v1319_v2, %v1867_v59  ;;  %v698_v5 = vpop.f32.mrb[3].mxu1 }
 0x1d5   : > { %v799_v0 = vmul.f32 1.442695, %v783_v1  ;;  %v1875_v6 = vadd.f32 %v1867_v59, %v698_v5 }
 0x1d6   : > { %1522 = vpow2.f32 %v801_v3  ;;  %v786_v7 = vmin.f32 %v1872_v4, 0.0  ;;  %vm770_vm4 = vcmp.gt.f32.partialorder %v1872_v4, 0.0 }
 0x1d7   : > { %1524 = vpow2.f32 %v799_v0  ;;  %v785_v9 = vmin.f32 %v1875_v6, 0.0  ;;  %v1322_v10 = vpop.f32.mrb[4].mxu1  ;;  %vm769_vm3 = vcmp.gt.f32.partialorder %v1875_v6, 0.0 }
 0x1d8   : > { %v805_v12 = vmul.f32 1.442695, %v786_v7  ;;  %v1880_v51 = vadd.f32 %v1322_v10, %v1867_v59  ;;  %v708_v13 = vpop.f32.mrb[5].mxu1 }
 0x1d9   : > { %v803_v14 = vmul.f32 1.442695, %v785_v9  ;;  %v1883_v15 = vadd.f32 %v1867_v59, %v708_v13 }
 0x1da   : > { %1526 = vpow2.f32 %v805_v12  ;;  %v788_v11 = vmin.f32 %v1880_v51, 0.0  ;;  %vm772_vm6 = vcmp.gt.f32.partialorder %v1880_v51, 0.0 }
 0x1db   : > { %1528 = vpow2.f32 %v803_v14  ;;  %v787_v17 = vmin.f32 %v1883_v15, 0.0  ;;  %v1325_v18 = vpop.f32.mrb[6].mxu1  ;;  %vm771_vm5 = vcmp.gt.f32.partialorder %v1883_v15, 0.0 }
 0x1dc   : > { %v809_v55 = vmul.f32 1.442695, %v788_v11  ;;  %v1888_v8 = vadd.f32 %v1325_v18, %v1867_v59  ;;  %v718_v20 = vpop.f32.mrb[7].mxu1 }
 0x1dd   : > { %v807_v21 = vmul.f32 1.442695, %v787_v17  ;;  %v1891_v22 = vadd.f32 %v1867_v59, %v718_v20 }
 0x1de   : > { %1530 = vpow2.f32 %v809_v55  ;;  %v790_v23 = vmin.f32 %v1888_v8, 0.0  ;;  %vm774_vm8 = vcmp.gt.f32.partialorder %v1888_v8, 0.0 }
 0x1df   : > { %1532 = vpow2.f32 %v807_v21  ;;  %v789_v54 = vmin.f32 %v1891_v22, 0.0  ;;  %v1328_v19 = vpop.f32.mrb[8].mxu1  ;;  %vm773_vm7 = vcmp.gt.f32.partialorder %v1891_v22, 0.0 }
 0x1e0   : > { %v1523_v24 = vpop.eup %1522  ;;  %v813_v26 = vmul.f32 1.442695, %v790_v23  ;;  %v1896_v27 = vadd.f32 %v1328_v19, %v1867_v59  ;;  %v728_v16 = vpop.f32.mrb[9].mxu1 }
 0x1e1   : > { %v1525_v28 = vpop.eup %1524  ;;  %v1148_v30 = vadd.f32 -1.0, %v1523_v24  ;;  %v811_v29 = vmul.f32 1.442695, %v789_v54  ;;  %v1899_v31 = vadd.f32 %v1867_v59, %v728_v16 }
 0x1e2   : > { %1534 = vpow2.f32 %v813_v26  ;;  %v792_v32 = vmin.f32 %v1896_v27, 0.0  ;;  %v1147_v25 = vadd.f32 -1.0, %v1525_v28  ;;  %vm776_vm10 = vcmp.gt.f32.partialorder %v1896_v27, 0.0 }
 0x1e3   : > { %1536 = vpow2.f32 %v811_v29  ;;  %v791_v33 = vmin.f32 %v1899_v31, 0.0  ;;  %v1331_v34 = vpop.f32.mrb[10].mxu1  ;;  %v848_v41 = vsel %vm768_vm2, %v694_v49, %v1148_v30  ;;  %vm775_vm9 = vcmp.gt.f32.partialorder %v1899_v31, 0.0 }
 0x1e4   : > { %v1527_v35 = vpop.eup %1526  ;;  %v817_v36 = vmul.f32 1.442695, %v792_v32  ;;  %v1904_v38 = vadd.f32 %v1331_v34, %v1867_v59  ;;  %v738_v39 = vpop.f32.mrb[11].mxu1  ;;  %v847_v37 = vsel %vm767_vm1, %v689_v62, %v1147_v25  ;;  %vm1031_vm1 = vcmask 64512  }
 0x1e5   : > { %v1529_v40 = vpop.eup %1528  ;;  %v815_v42 = vmul.f32 1.442695, %v791_v33  ;;  %v1907_v43 = vadd.f32 %v1867_v59, %v738_v39  ;;  %1370 = vmatprep.mubr.f32.mxu0 %v847_v37  ;;  %v1150_v44 = vadd.f32 -1.0, %v1527_v35 }
 0x1e6   : > { %1538 = vpow2.f32 %v817_v36  ;;  %v794_v45 = vmin.f32 %v1904_v38, 0.0  ;;  %1371 = vmatmul.mubr.f32.vlgmr.msra.gmra.mrb[16].mxu0 %v848_v41  ;;  %v1149_v46 = vadd.f32 -1.0, %v1529_v40  ;;  %vm778_vm12 = vcmp.gt.f32.partialorder %v1904_v38, 0.0  ;;  %v1163_v40 = vld [vmem:[%s2001_s6] ss:$0 sm:$0xff] }
 0x1e7   : > { %1540 = vpow2.f32 %v815_v42  ;;  %v793_v47 = vmin.f32 %v1907_v43, 0.0  ;;  %v1334_v48 = vpop.f32.mrb[12].mxu1  ;;  %v850_v61 = vsel %vm770_vm4, %v1872_v4, %v1150_v44  ;;  %vm777_vm11 = vcmp.gt.f32.partialorder %v1907_v43, 0.0 }
 0x1e8   : > { %v1531_v50 = vpop.eup %1530  ;;  %v821_v52 = vmul.f32 1.442695, %v794_v45  ;;  %v1913_v53 = vadd.f32 %v1334_v48, %v1867_v59  ;;  %v748_v56 = vpop.f32.mrb[13].mxu1  ;;  %v849_v57 = vsel %vm769_vm3, %v1875_v6, %v1149_v46 }
 0x1e9   : > { %v1533_v58 = vpop.eup %1532  ;;  %v819_v60 = vmul.f32 1.442695, %v793_v47  ;;  %v1918_v49 = vadd.f32 %v1867_v59, %v748_v56  ;;  %1373 = vmatprep.mubr.f32.mxu0 %v849_v57  ;;  %v1152_v62 = vadd.f32 -1.0, %v1531_v50 }
 0x1ea   : > { %1542 = vpow2.f32 %v821_v52  ;;  %v796_v63 = vmin.f32 %v1913_v53, 0.0  ;;  %1374 = vmatmul.mubr.f32.gmra.mrb[18].mxu0 %v850_v61  ;;  %v1151_v1 = vadd.f32 -1.0, %v1533_v58  ;;  %vm780_vm14 = vcmp.gt.f32.partialorder %v1913_v53, 0.0 }
 0x1eb   : > { %1544 = vpow2.f32 %v819_v60  ;;  %v795_v2 = vmin.f32 %v1918_v49, 0.0  ;;  %v1337_v3 = vpop.f32.mrb[14].mxu1  ;;  %v852_v13 = vsel %vm772_vm6, %v1880_v51, %v1152_v62  ;;  %vm779_vm13 = vcmp.gt.f32.partialorder %v1918_v49, 0.0 }
 0x1ec   : > { %v1535_v5 = vpop.eup %1534  ;;  %v825_v0 = vmul.f32 1.442695, %v796_v63  ;;  %v1925_v6 = vadd.f32 %v1337_v3, %v1867_v59  ;;  %v758_v7 = vpop.f32.mrb[15].mxu1  ;;  %v851_v4 = vsel %vm771_vm5, %v1883_v15, %v1151_v1 }
 0x1ed   : > { %v1537_v9 = vpop.eup %1536  ;;  %v823_v10 = vmul.f32 1.442695, %v795_v2  ;;  %v759_v12 = vadd.f32 %v1867_v59, %v758_v7  ;;  %1376 = vmatprep.mubr.f32.mxu0 %v851_v4  ;;  %v1154_v14 = vadd.f32 -1.0, %v1535_v5 }
 0x1ee   : > { %1546 = vpow2.f32 %v825_v0  ;;  %v798_v11 = vmin.f32 %v1925_v6, 0.0  ;;  %1377 = vmatmul.mubr.f32.gmra.mrb[20].mxu0 %v852_v13  ;;  %v1153_v17 = vadd.f32 -1.0, %v1537_v9  ;;  %vm782_vm0 = vcmp.gt.f32.partialorder %v1925_v6, 0.0 }
 0x1ef   : > { %1548 = vpow2.f32 %v823_v10  ;;  %v797_v18 = vmin.f32 %v759_v12, 0.0  ;;  %v854_v51 = vsel %vm774_vm8, %v1888_v8, %v1154_v14  ;;  %vm781_vm15 = vcmp.gt.f32.partialorder %v759_v12, 0.0 }
 0x1f0   : > { %v1539_v15 = vpop.eup %1538  ;;  %v829_v55 = vmul.f32 1.442695, %v798_v11  ;;  %v853_v20 = vsel %vm773_vm7, %v1891_v22, %v1153_v17 }
 0x1f1   : > { %v1541_v59 = vpop.eup %1540  ;;  %v827_v21 = vmul.f32 1.442695, %v797_v18  ;;  %1379 = vmatprep.mubr.f32.mxu0 %v853_v20  ;;  %v1156_v23 = vadd.f32 -1.0, %v1539_v15 }
 0x1f2   : > { %1550 = vpow2.f32 %v829_v55  ;;  %1380 = vmatmul.mubr.f32.gmra.mrb[22].mxu0 %v854_v51  ;;  %v1155_v54 = vadd.f32 -1.0, %v1541_v59 }
 0x1f3   : > { %1552 = vpow2.f32 %v827_v21  ;;  %v856_v26 = vsel %vm776_vm10, %v1896_v27, %v1156_v23 }
 0x1f4   : > { %v1543_v19 = vpop.eup %1542  ;;  %v855_v24 = vsel %vm775_vm9, %v1899_v31, %v1155_v54 }
 0x1f5   : > { %v1545_v22 = vpop.eup %1544  ;;  %1382 = vmatprep.mubr.f32.mxu0 %v855_v24  ;;  %v1158_v16 = vadd.f32 -1.0, %v1543_v19 }
 0x1f6   : > { %1383 = vmatmul.mubr.f32.gmra.mrb[24].mxu0 %v856_v26  ;;  %v1157_v28 = vadd.f32 -1.0, %v1545_v22 }
 0x1f7   : > { %v858_v31 = vsel %vm778_vm12, %v1904_v38, %v1158_v16 }
 0x1f8   : > { %v1547_v8 = vpop.eup %1546  ;;  %v857_v30 = vsel %vm777_vm11, %v1907_v43, %v1157_v28 }
 0x1f9   : > { %v1549_v29 = vpop.eup %1548  ;;  %1385 = vmatprep.mubr.f32.mxu0 %v857_v30  ;;  %v1160_v32 = vadd.f32 -1.0, %v1547_v8 }
 0x1fa   : > { %1386 = vmatmul.mubr.f32.gmra.mrb[26].mxu0 %v858_v31  ;;  %v1159_v25 = vadd.f32 -1.0, %v1549_v29 }
 0x1fb   : > { %v860_v36 = vsel %vm780_vm14, %v1913_v53, %v1160_v32 }
 0x1fc   : > { %v1551_v27 = vpop.eup %1550  ;;  %v859_v33 = vsel %vm779_vm13, %v1918_v49, %v1159_v25 }
 0x1fd   : > { %v1553_v34 = vpop.eup %1552  ;;  %v1162_v35 = vadd.f32 -1.0, %v1551_v27  ;;  %1388 = vmatprep.mubr.f32.mxu0 %v859_v33 }
 0x1fe   : > { %1389 = vmatmul.mubr.f32.gmra.mrb[28].mxu0 %v860_v36  ;;  %v1161_v39 = vadd.f32 -1.0, %v1553_v34 }
 0x1ff   : > { %v862_v37 = vsel %vm782_vm0, %v1925_v6, %v1162_v35 }
 0x200   : > { %v861_v38 = vsel %vm781_vm15, %v759_v12, %v1161_v39 }
 0x201   : > { %1391 = vmatprep.mubr.f32.mxu1 %v861_v38 }
 0x202   : > { %1392 = vmatmul.mubr.f32.vlgmr.msra.gmra.mrb[16].mxu1 %v862_v37 }
 0x2b9   : > { %v1372_v41 = vpop.f32.mrb[16].mxu0 }
 0x2ba   : > { %v958_v42 = vadd.f32 %v1372_v41, %v1163_v40  ;;  %v952_v43 = vpop.f32.mrb[17].mxu0 }
 0x2bb   : > { %v953_v44 = vadd.f32 %v1163_v40, %v952_v43 }
 0x2bc   : > { %1033 = vst.msk [vmem:[%s1958_s29 + $0x8] sm:$0xff] %vm1031_vm1, %v958_v42 }
 0x2bd   : > { %1032 = vst.msk [vmem:[%s1958_s29] sm:$0xff] %vm1031_vm1, %v953_v44  ;;  %v1375_v45 = vpop.f32.mrb[18].mxu0 }
 0x2be   : > { %v968_v46 = vadd.f32 %v1375_v45, %v1163_v40  ;;  %v962_v47 = vpop.f32.mrb[19].mxu0 }
 0x2bf   : > { %v963_v48 = vadd.f32 %v1163_v40, %v962_v47 }
 0x2c0   : > { %1035 = vst.msk [vmem:[%s1958_s29 + $0x18] sm:$0xff] %vm1031_vm1, %v968_v46 }
 0x2c1   : > { %1034 = vst.msk [vmem:[%s1958_s29 + $0x10] sm:$0xff] %vm1031_vm1, %v963_v48  ;;  %v1378_v50 = vpop.f32.mrb[20].mxu0 }
 0x2c2   : > { %v978_v52 = vadd.f32 %v1378_v50, %v1163_v40  ;;  %v972_v53 = vpop.f32.mrb[21].mxu0 }
 0x2c3   : > { %v973_v56 = vadd.f32 %v1163_v40, %v972_v53 }
 0x2c4   : > { %1037 = vst.msk [vmem:[%s1958_s29 + $0x28] sm:$0xff] %vm1031_vm1, %v978_v52 }
 0x2c5   : > { %1036 = vst.msk [vmem:[%s1958_s29 + $0x20] sm:$0xff] %vm1031_vm1, %v973_v56  ;;  %v1381_v57 = vpop.f32.mrb[22].mxu0 }
 0x2c6   : > { %v988_v58 = vadd.f32 %v1381_v57, %v1163_v40  ;;  %v982_v60 = vpop.f32.mrb[23].mxu0 }
 0x2c7   : > { %v983_v49 = vadd.f32 %v1163_v40, %v982_v60 }
 0x2c8   : > { %1039 = vst.msk [vmem:[%s1958_s29 + $0x38] sm:$0xff] %vm1031_vm1, %v988_v58 }
 0x2c9   : > { %1038 = vst.msk [vmem:[%s1958_s29 + $0x30] sm:$0xff] %vm1031_vm1, %v983_v49  ;;  %v1384_v61 = vpop.f32.mrb[24].mxu0 }
 0x2ca   : > { %v998_v62 = vadd.f32 %v1384_v61, %v1163_v40  ;;  %v992_v63 = vpop.f32.mrb[25].mxu0 }
 0x2cb   : > { %v993_v1 = vadd.f32 %v1163_v40, %v992_v63 }
 0x2cc   : > { %1041 = vst.msk [vmem:[%s1958_s29 + $0x48] sm:$0xff] %vm1031_vm1, %v998_v62 }
 0x2cd   : > { %1040 = vst.msk [vmem:[%s1958_s29 + $0x40] sm:$0xff] %vm1031_vm1, %v993_v1  ;;  %v1387_v2 = vpop.f32.mrb[26].mxu0 }
 0x2ce   : > { %v1008_v3 = vadd.f32 %v1387_v2, %v1163_v40  ;;  %v1002_v5 = vpop.f32.mrb[27].mxu0 }
 0x2cf   : > { %v1003_v0 = vadd.f32 %v1163_v40, %v1002_v5 }
 0x2d0   : > { %1043 = vst.msk [vmem:[%s1958_s29 + $0x58] sm:$0xff] %vm1031_vm1, %v1008_v3 }
 0x2d1   : > { %1042 = vst.msk [vmem:[%s1958_s29 + $0x50] sm:$0xff] %vm1031_vm1, %v1003_v0  ;;  %v1390_v6 = vpop.f32.mrb[28].mxu0 }
 0x2d2   : > { %v1018_v7 = vadd.f32 %v1390_v6, %v1163_v40  ;;  %v1012_v4 = vpop.f32.mrb[29].mxu0 }
 0x2d3   : > { %v1013_v9 = vadd.f32 %v1163_v40, %v1012_v4 }
 0x2d4   : > { %1045 = vst.msk [vmem:[%s1958_s29 + $0x68] sm:$0xff] %vm1031_vm1, %v1018_v7 }
 0x2d5   : > { %1044 = vst.msk [vmem:[%s1958_s29 + $0x60] sm:$0xff] %vm1031_vm1, %v1013_v9  ;;  %v1393_v10 = vpop.f32.mrb[16].mxu1 }
 0x2d6   : > { %v1028_v12 = vadd.f32 %v1393_v10, %v1163_v40  ;;  %v1022_v13 = vpop.f32.mrb[17].mxu1 }
 0x2d7   : > { %v1023_v14 = vadd.f32 %v1163_v40, %v1022_v13 }
 0x2d8   : > { %1047 = vst.msk [vmem:[%s1958_s29 + $0x78] sm:$0xff] %vm1031_vm1, %v1028_v12 }
 0x2d9   : > { %1046 = vst.msk [vmem:[%s1958_s29 + $0x70] sm:$0xff] %vm1031_vm1, %v1023_v14 }
 0x2da PF: > { %s17_s24 = sadd.s32 1, %s1560_s24  }
 0x2db   : > { %p14_p4 = scmp.ge.s32.totalorder %s17_s24, 4  }
 0x2dd   :  { %16 = sbr.rel (!%p14_p4) target bundleno = 1 (0x1), region = 78 }

</bundles_post_ra>
